<compile_context>
chip_gen: v7x
topology: tpu7x:2x2x1
jax: 0.10.0
libtpu: 0.0.40
codegen_flags: <defaults>
</compile_context>

<pallas_src>
import jax
import jax.numpy as jnp
from jax.experimental import pallas as pl
from jax.experimental.pallas import tpu as pltpu

SIZE_LAYER = 128          # size_layer in the PyTorch module (three_layers = False)
MATMUL_DTYPE = jnp.bfloat16   # MXU operand dtype; accumulation stays f32
MAX_BATCH_BLOCK = 512     # conservative batch tile (fits v7x 64 MiB VMEM easily)


def critic_kernel(
    xh_ref, act_ref,
    w_rnn_ref, b_rnn_ref,
    w1h_ref, w1a_ref, b1_ref,
    w2_ref, b2_ref,
    wo_ref, bo_ref,
    q_ref, h_out_ref,
):
    # ---- fused RNNCell: tanh([inputs|h] @ [W_ih; W_hh] + (b_ih + b_hh)) ----
    xh = xh_ref[...].astype(MATMUL_DTYPE)
    pre = (
        jnp.dot(xh, w_rnn_ref[...], preferred_element_type=jnp.float32)
        + b_rnn_ref[...]
    )
    h_new = jnp.tanh(pre)                       # f32 elementwise (v5e-safe)
    h_out_ref[...] = h_new

    # ---- hidden_layer1 on cat([h_new, action], 1) as a split matmul ----
    a = act_ref[...].astype(MATMUL_DTYPE)
    y = (
        jnp.dot(h_new.astype(MATMUL_DTYPE), w1h_ref[...],
                preferred_element_type=jnp.float32)
        + jnp.dot(a, w1a_ref[...], preferred_element_type=jnp.float32)
        + b1_ref[...]
    )
    y = jnp.maximum(y, 0.0)

    # ---- hidden_layer2 ----
    y = (
        jnp.dot(y.astype(MATMUL_DTYPE), w2_ref[...],
                preferred_element_type=jnp.float32)
        + b2_ref[...]
    )
    y = jnp.maximum(y, 0.0)

    # ---- output_layer: N=1 matmul as VPU multiply + lane reduction ----
    q_ref[...] = jnp.sum(y * wo_ref[...], axis=-1, keepdims=True) + bo_ref[...]


def critic_forward(params, inputs, action, h_critic):
    """inputs: [B, obs+act+1], action: [B, act], h_critic: [B, 128]
       -> (q [B, 1], h' [B, 128])"""
    B = inputs.shape[0]
    H = SIZE_LAYER
    A = action.shape[1]

    # Fuse the two RNN matmul operands into one [B, input_dim + H] array.
    xh = jnp.concatenate(
        [inputs.astype(jnp.float32), h_critic.astype(jnp.float32)], axis=1
    )
    K = xh.shape[1]
    action = action.astype(jnp.float32)

    tb = B if B <= MAX_BATCH_BLOCK else MAX_BATCH_BLOCK
    grid = (pl.cdiv(B, tb),)

    row_map = lambda i: (i, 0)     # activations / outputs: tiled over batch
    const_map = lambda i: (0, 0)   # weights / biases: VMEM-resident across blocks

    in_specs = [
        pl.BlockSpec((tb, K), row_map),      # xh
        pl.BlockSpec((tb, A), row_map),      # action
        pl.BlockSpec((K, H), const_map),     # w_rnn (stacked [w_ih; w_hh])
        pl.BlockSpec((1, H), const_map),     # b_rnn (b_ih + b_hh folded)
        pl.BlockSpec((H, H), const_map),     # w1_h
        pl.BlockSpec((A, H), const_map),     # w1_a
        pl.BlockSpec((1, H), const_map),     # b1
        pl.BlockSpec((H, H), const_map),     # w2
        pl.BlockSpec((1, H), const_map),     # b2
        pl.BlockSpec((1, H), const_map),     # wo (row vector, used on VPU)
        pl.BlockSpec((1, 1), const_map),     # bo
    ]
    out_specs = (
        pl.BlockSpec((tb, 1), row_map),      # q
        pl.BlockSpec((tb, H), row_map),      # h'
    )

    # TODO(synk): if this critic is unrolled over timesteps, pull the time loop
    # into the kernel (arbitrary grid axis, resident weights) and alias h->h'.
    return pl.pallas_call(
        critic_kernel,
        out_shape=(
            jax.ShapeDtypeStruct((B, 1), jnp.float32),
            jax.ShapeDtypeStruct((B, H), jnp.float32),
        ),
        grid=grid,
        in_specs=in_specs,
        out_specs=out_specs,
        compiler_params=pltpu.CompilerParams(
            dimension_semantics=("parallel",),
            vmem_limit_bytes=32 * 1024 * 1024,
        ),
    )(
        xh, action,
        params["w_rnn"], params["b_rnn"],
        params["w1_h"], params["w1_a"], params["b1"],
        params["w2"], params["b2"],
        params["wo_row"], params["bo"],
    )


def weight_init(key, size):
    # mirrors: torch.randn(size) * sqrt(2 / (size[0] + size[1]))
    scale = jnp.sqrt(2.0 / (size[0] + size[1]))
    return jax.random.normal(key, size, dtype=jnp.float32) * scale


def make_params(key, observation_dim, action_dim):
    input_dim = observation_dim + action_dim + 1
    H = SIZE_LAYER
    ks = jax.random.split(key, 12)

    # PyTorch stores weights as [out, in]; init with that shape, transpose to
    # [in, out] for the kernel's x @ W convention.
    w_ih = weight_init(ks[0], (H, input_dim)).T            # [input_dim, H]
    w_hh = weight_init(ks[1], (H, H)).T                    # [H, H]
    w1 = weight_init(ks[2], (H, H + action_dim)).T         # [H + act, H]
    w2 = weight_init(ks[3], (H, H)).T                      # [H, H]
    wo = weight_init(ks[4], (1, H))                        # [1, H] row vector

    def bias(k, fan_in, n):
        bound = 1.0 / jnp.sqrt(jnp.float32(fan_in))
        return jax.random.uniform(k, (1, n), jnp.float32, -bound, bound)

    b_ih = bias(ks[5], H, H)
    b_hh = bias(ks[6], H, H)

    params = {
        # fused RNN weight: [inputs | h] @ [w_ih; w_hh]  (bf16 MXU operand)
        "w_rnn": jnp.concatenate([w_ih, w_hh], axis=0).astype(MATMUL_DTYPE),
        "b_rnn": b_ih + b_hh,                              # folded bias, f32
        # split W1 rows into the h-part and the action-part (cat == split matmul)
        "w1_h": w1[:H, :].astype(MATMUL_DTYPE),
        "w1_a": w1[H:, :].astype(MATMUL_DTYPE),
        "b1": bias(ks[7], H + action_dim, H),
        "w2": w2.astype(MATMUL_DTYPE),
        "b2": bias(ks[8], H, H),
        "wo_row": wo,                                      # f32 (VPU path)
        "bo": bias(ks[9], H, 1),
    }
    return params


if __name__ == "__main__":
    observation_dim = 8
    action_dim = 4
    batch = 2

    key = jax.random.PRNGKey(0)
    k_params, k_in, k_act = jax.random.split(key, 3)

    params = make_params(k_params, observation_dim, action_dim)

    inputs = jax.random.normal(
        k_in, (batch, observation_dim + action_dim + 1), dtype=jnp.float32
    )
    action = jax.random.normal(k_act, (batch, action_dim), dtype=jnp.float32)
    h0 = jnp.zeros((batch, SIZE_LAYER), dtype=jnp.float32)  # init_hidden_state

    q, h_new = critic_forward(params, inputs, action, h0)
    jax.block_until_ready((q, h_new))

    assert q.shape == (batch, 1)
    assert h_new.shape == (batch, SIZE_LAYER)
    print("KERNEL_OK")
</pallas_src>

<mosaic_0001>
module attributes {stable_mosaic.version = 11 : i64} {
  func.func @critic_kernel(%arg0: i32, %arg1: memref<2x141xf32, #tpu.memory_space<vmem>>, %arg2: memref<2x4xf32, #tpu.memory_space<vmem>>, %arg3: memref<141x128xbf16, #tpu.memory_space<vmem>>, %arg4: memref<1x128xf32, #tpu.memory_space<vmem>>, %arg5: memref<128x128xbf16, #tpu.memory_space<vmem>>, %arg6: memref<4x128xbf16, #tpu.memory_space<vmem>>, %arg7: memref<1x128xf32, #tpu.memory_space<vmem>>, %arg8: memref<128x128xbf16, #tpu.memory_space<vmem>>, %arg9: memref<1x128xf32, #tpu.memory_space<vmem>>, %arg10: memref<1x128xf32, #tpu.memory_space<vmem>>, %arg11: memref<1x1xf32, #tpu.memory_space<vmem>>, %arg12: memref<2x1xf32, #tpu.memory_space<vmem>>, %arg13: memref<2x128xf32, #tpu.memory_space<vmem>>) attributes {dimension_semantics = [#tpu.dimension_semantics<parallel>], iteration_bounds = array<i64: 1>, scalar_prefetch = 0 : i64, scratch_operands = 0 : i64, tpu.core_type = #tpu.core_type<tc>, window_params = [{transform_indices = @transform_0, window_bounds = array<i64: 2, 141>}, {transform_indices = @transform_1, window_bounds = array<i64: 2, 4>}, {pipeline_mode = #tpu.pipeline_mode<synchronous>, transform_indices = @transform_2, window_bounds = array<i64: 141, 128>}, {pipeline_mode = #tpu.pipeline_mode<synchronous>, transform_indices = @transform_3, window_bounds = array<i64: 1, 128>}, {pipeline_mode = #tpu.pipeline_mode<synchronous>, transform_indices = @transform_4, window_bounds = array<i64: 128, 128>}, {pipeline_mode = #tpu.pipeline_mode<synchronous>, transform_indices = @transform_5, window_bounds = array<i64: 4, 128>}, {pipeline_mode = #tpu.pipeline_mode<synchronous>, transform_indices = @transform_6, window_bounds = array<i64: 1, 128>}, {pipeline_mode = #tpu.pipeline_mode<synchronous>, transform_indices = @transform_7, window_bounds = array<i64: 128, 128>}, {pipeline_mode = #tpu.pipeline_mode<synchronous>, transform_indices = @transform_8, window_bounds = array<i64: 1, 128>}, {pipeline_mode = #tpu.pipeline_mode<synchronous>, transform_indices = @transform_9, window_bounds = array<i64: 1, 128>}, {pipeline_mode = #tpu.pipeline_mode<synchronous>, transform_indices = @transform_10, window_bounds = array<i64: 1, 1>}, {transform_indices = @transform_11, window_bounds = array<i64: 2, 1>}, {transform_indices = @transform_12, window_bounds = array<i64: 2, 128>}]} {
    %c0 = arith.constant 0 : index
    %c0_0 = arith.constant 0 : index
    %0 = vector.load %arg1[%c0, %c0_0] : memref<2x141xf32, #tpu.memory_space<vmem>>, vector<2x141xf32>
    %1 = arith.truncf %0 : vector<2x141xf32> to vector<2x141xbf16>
    %c0_1 = arith.constant 0 : index
    %c0_2 = arith.constant 0 : index
    %2 = vector.load %arg3[%c0_1, %c0_2] : memref<141x128xbf16, #tpu.memory_space<vmem>>, vector<141x128xbf16>
    %cst = arith.constant dense<0.000000e+00> : vector<2x128xf32>
    %3 = tpu.matmul %1, %2, %cst {dimension_numbers = #tpu.dot_dimension_numbers<[1], [0], [0], [1], [0, 0, 1, 1], [], []>} : vector<2x141xbf16>, vector<141x128xbf16>, vector<2x128xf32> -> vector<2x128xf32>
    %c0_3 = arith.constant 0 : index
    %c0_4 = arith.constant 0 : index
    %4 = vector.load %arg4[%c0_3, %c0_4] : memref<1x128xf32, #tpu.memory_space<vmem>>, vector<1x128xf32>
    %5 = vector.broadcast %4 : vector<1x128xf32> to vector<2x128xf32>
    %6 = arith.addf %3, %5 : vector<2x128xf32>
    %7 = math.tanh %6 : vector<2x128xf32>
    %c0_5 = arith.constant 0 : index
    %c0_6 = arith.constant 0 : index
    %8 = vector.load %arg13[%c0_5, %c0_6] : memref<2x128xf32, #tpu.memory_space<vmem>>, vector<2x128xf32>
    tpu.vector_store %arg13[%c0_5, %c0_6], %7 {strides = array<i32>} : memref<2x128xf32, #tpu.memory_space<vmem>>, vector<2x128xf32>,
    %c0_7 = arith.constant 0 : index
    %c0_8 = arith.constant 0 : index
    %9 = vector.load %arg2[%c0_7, %c0_8] : memref<2x4xf32, #tpu.memory_space<vmem>>, vector<2x4xf32>
    %10 = arith.truncf %9 : vector<2x4xf32> to vector<2x4xbf16>
    %11 = arith.truncf %7 : vector<2x128xf32> to vector<2x128xbf16>
    %c0_9 = arith.constant 0 : index
    %c0_10 = arith.constant 0 : index
    %12 = vector.load %arg5[%c0_9, %c0_10] : memref<128x128xbf16, #tpu.memory_space<vmem>>, vector<128x128xbf16>
    %cst_11 = arith.constant dense<0.000000e+00> : vector<2x128xf32>
    %13 = tpu.matmul %11, %12, %cst_11 {dimension_numbers = #tpu.dot_dimension_numbers<[1], [0], [0], [1], [0, 0, 1, 1], [], []>} : vector<2x128xbf16>, vector<128x128xbf16>, vector<2x128xf32> -> vector<2x128xf32>
    %c0_12 = arith.constant 0 : index
    %c0_13 = arith.constant 0 : index
    %14 = vector.load %arg6[%c0_12, %c0_13] : memref<4x128xbf16, #tpu.memory_space<vmem>>, vector<4x128xbf16>
    %cst_14 = arith.constant dense<0.000000e+00> : vector<2x128xf32>
    %15 = tpu.matmul %10, %14, %cst_14 {dimension_numbers = #tpu.dot_dimension_numbers<[1], [0], [0], [1], [0, 0, 1, 1], [], []>} : vector<2x4xbf16>, vector<4x128xbf16>, vector<2x128xf32> -> vector<2x128xf32>
    %16 = arith.addf %13, %15 : vector<2x128xf32>
    %c0_15 = arith.constant 0 : index
    %c0_16 = arith.constant 0 : index
    %17 = vector.load %arg7[%c0_15, %c0_16] : memref<1x128xf32, #tpu.memory_space<vmem>>, vector<1x128xf32>
    %18 = vector.broadcast %17 : vector<1x128xf32> to vector<2x128xf32>
    %19 = arith.addf %16, %18 : vector<2x128xf32>
    %cst_17 = arith.constant 0.000000e+00 : f32
    %20 = vector.broadcast %cst_17 : f32 to vector<2x128xf32>
    %21 = arith.maximumf %19, %20 : vector<2x128xf32>
    %22 = arith.truncf %21 : vector<2x128xf32> to vector<2x128xbf16>
    %c0_18 = arith.constant 0 : index
    %c0_19 = arith.constant 0 : index
    %23 = vector.load %arg8[%c0_18, %c0_19] : memref<128x128xbf16, #tpu.memory_space<vmem>>, vector<128x128xbf16>
    %cst_20 = arith.constant dense<0.000000e+00> : vector<2x128xf32>
    %24 = tpu.matmul %22, %23, %cst_20 {dimension_numbers = #tpu.dot_dimension_numbers<[1], [0], [0], [1], [0, 0, 1, 1], [], []>} : vector<2x128xbf16>, vector<128x128xbf16>, vector<2x128xf32> -> vector<2x128xf32>
    %c0_21 = arith.constant 0 : index
    %c0_22 = arith.constant 0 : index
    %25 = vector.load %arg9[%c0_21, %c0_22] : memref<1x128xf32, #tpu.memory_space<vmem>>, vector<1x128xf32>
    %26 = vector.broadcast %25 : vector<1x128xf32> to vector<2x128xf32>
    %27 = arith.addf %24, %26 : vector<2x128xf32>
    %cst_23 = arith.constant 0.000000e+00 : f32
    %28 = vector.broadcast %cst_23 : f32 to vector<2x128xf32>
    %29 = arith.maximumf %27, %28 : vector<2x128xf32>
    %c0_24 = arith.constant 0 : index
    %c0_25 = arith.constant 0 : index
    %30 = vector.load %arg10[%c0_24, %c0_25] : memref<1x128xf32, #tpu.memory_space<vmem>>, vector<1x128xf32>
    %31 = vector.broadcast %30 : vector<1x128xf32> to vector<2x128xf32>
    %32 = arith.mulf %29, %31 : vector<2x128xf32>
    %cst_26 = arith.constant dense<0.000000e+00> : vector<2xf32>
    %33 = vector.multi_reduction <add>, %32, %cst_26 [1] : vector<2x128xf32> to vector<2xf32>
    %34 = vector.shape_cast %33 : vector<2xf32> to vector<2x1xf32>
    %c0_27 = arith.constant 0 : index
    %c0_28 = arith.constant 0 : index
    %35 = vector.load %arg11[%c0_27, %c0_28] : memref<1x1xf32, #tpu.memory_space<vmem>>, vector<1x1xf32>
    %36 = vector.broadcast %35 : vector<1x1xf32> to vector<2x1xf32>
    %37 = arith.addf %34, %36 : vector<2x1xf32>
    %c0_29 = arith.constant 0 : index
    %c0_30 = arith.constant 0 : index
    %38 = vector.load %arg12[%c0_29, %c0_30] : memref<2x1xf32, #tpu.memory_space<vmem>>, vector<2x1xf32>
    tpu.vector_store %arg12[%c0_29, %c0_30], %37 {strides = array<i32>} : memref<2x1xf32, #tpu.memory_space<vmem>>, vector<2x1xf32>,
    return
  }
  func.func @transform_0(%arg0: i32) -> (i32, i32) {
    %c0_i32 = arith.constant 0 : i32
    %c0_i32_0 = arith.constant 0 : i32
    return %arg0, %c0_i32 : i32, i32
  }
  func.func @transform_1(%arg0: i32) -> (i32, i32) {
    %c0_i32 = arith.constant 0 : i32
    %c0_i32_0 = arith.constant 0 : i32
    return %arg0, %c0_i32 : i32, i32
  }
  func.func @transform_2(%arg0: i32) -> (i32, i32) {
    %c0_i32 = arith.constant 0 : i32
    %c0_i32_0 = arith.constant 0 : i32
    %c0_i32_1 = arith.constant 0 : i32
    return %c0_i32, %c0_i32_0 : i32, i32
  }
  func.func @transform_3(%arg0: i32) -> (i32, i32) {
    %c0_i32 = arith.constant 0 : i32
    %c0_i32_0 = arith.constant 0 : i32
    %c0_i32_1 = arith.constant 0 : i32
    return %c0_i32, %c0_i32_0 : i32, i32
  }
  func.func @transform_4(%arg0: i32) -> (i32, i32) {
    %c0_i32 = arith.constant 0 : i32
    %c0_i32_0 = arith.constant 0 : i32
    %c0_i32_1 = arith.constant 0 : i32
    return %c0_i32, %c0_i32_0 : i32, i32
  }
  func.func @transform_5(%arg0: i32) -> (i32, i32) {
    %c0_i32 = arith.constant 0 : i32
    %c0_i32_0 = arith.constant 0 : i32
    %c0_i32_1 = arith.constant 0 : i32
    return %c0_i32, %c0_i32_0 : i32, i32
  }
  func.func @transform_6(%arg0: i32) -> (i32, i32) {
    %c0_i32 = arith.constant 0 : i32
    %c0_i32_0 = arith.constant 0 : i32
    %c0_i32_1 = arith.constant 0 : i32
    return %c0_i32, %c0_i32_0 : i32, i32
  }
  func.func @transform_7(%arg0: i32) -> (i32, i32) {
    %c0_i32 = arith.constant 0 : i32
    %c0_i32_0 = arith.constant 0 : i32
    %c0_i32_1 = arith.constant 0 : i32
    return %c0_i32, %c0_i32_0 : i32, i32
  }
  func.func @transform_8(%arg0: i32) -> (i32, i32) {
    %c0_i32 = arith.constant 0 : i32
    %c0_i32_0 = arith.constant 0 : i32
    %c0_i32_1 = arith.constant 0 : i32
    return %c0_i32, %c0_i32_0 : i32, i32
  }
  func.func @transform_9(%arg0: i32) -> (i32, i32) {
    %c0_i32 = arith.constant 0 : i32
    %c0_i32_0 = arith.constant 0 : i32
    %c0_i32_1 = arith.constant 0 : i32
    return %c0_i32, %c0_i32_0 : i32, i32
  }
  func.func @transform_10(%arg0: i32) -> (i32, i32) {
    %c0_i32 = arith.constant 0 : i32
    %c0_i32_0 = arith.constant 0 : i32
    %c0_i32_1 = arith.constant 0 : i32
    return %c0_i32, %c0_i32_0 : i32, i32
  }
  func.func @transform_11(%arg0: i32) -> (i32, i32) {
    %c0_i32 = arith.constant 0 : i32
    %c0_i32_0 = arith.constant 0 : i32
    return %arg0, %c0_i32 : i32, i32
  }
  func.func @transform_12(%arg0: i32) -> (i32, i32) {
    %c0_i32 = arith.constant 0 : i32
    %c0_i32_0 = arith.constant 0 : i32
    return %arg0, %c0_i32 : i32, i32
  }
}

</mosaic_0001>

<bundles_post_ra>
// kernel: tpu_custom_call.1
= control target key start
LH: loop header
LB: loop body
LE: loop exit
PB: predicated region body
PF: predicated region fallthrough
CT: control target
= control target key end

     0   :  { %s1022_s0 = inlined_call_operand.hbm [shape: f32[2,141], index: 0, kind: input, shape index: {}]   ;;  %s1023_s1 = inlined_call_operand.vmem [shape: f32[2,4], index: 1, kind: input, shape index: {}]   ;;  %s1024_s2 = inlined_call_operand.hbm [shape: bf16[141,128], index: 2, kind: input, shape index: {}]   ;;  %s1025_s3 = inlined_call_operand.vmem [shape: f32[1,128], index: 3, kind: input, shape index: {}]   ;;  %s1026_s4 = inlined_call_operand.hbm [shape: bf16[128,128], index: 4, kind: input, shape index: {}]   ;;  %s1027_s5 = inlined_call_operand.vmem [shape: bf16[4,128], index: 5, kind: input, shape index: {}]   ;;  %s1028_s6 = inlined_call_operand.vmem [shape: f32[1,128], index: 6, kind: input, shape index: {}]   ;;  %s1029_s7 = inlined_call_operand.hbm [shape: bf16[128,128], index: 7, kind: input, shape index: {}]   ;;  %s1030_s8 = inlined_call_operand.vmem [shape: f32[1,128], index: 8, kind: input, shape index: {}]   ;;  %s1031_s9 = inlined_call_operand.vmem [shape: f32[1,128], index: 9, kind: input, shape index: {}]   ;;  %s1032_s10 = inlined_call_operand.<no memory space> [shape: f32[1,1], index: 10, kind: input, shape index: {}]   ;;  %s1033_s11 = inlined_call_operand.vmem [shape: f32[2,1], index: 11, kind: output, shape index: {0}]   ;;  %s1034_s12 = inlined_call_operand.hbm [shape: f32[2,128], index: 12, kind: output, shape index: {1}]  }
   0x1   :  { %v18_v0 = vstv %s1032_s10 }
   0x2   :  { %19 = vst [vmem:[#allocation2] sm:$0x1] %v18_v0 }
   0x3   :  { %20 = vsyncpa [#allocation4], 0 }
   0x4   :  { %21 = vsyncpa [#allocation7], 0 }
   0x5   :  { %22 = vsyncpa [#allocation10], 0 }
   0x6   :  { %23 = vsyncpa [#allocation5], 0  ;;  %s817_s23 = smov [#allocation6]   ;;  %s699_s27 = scalar_lea.hbm %s1024_s2, 1152 }
   0x7   :  { %s41_s24 = sshll.u32 %s817_s23, 4  ;;  %p700_p0 = scmp.ne.s32.totalorder %s1024_s2, %s699_s27  ;;  %s42_s24 = int_to_ptr.vmem [resolvable:$true] %s41_s24 }
   0x8   :  { %p703_p1 = scmp.lt.u32.totalorder %s699_s27, %s1024_s2 }
   0xa   :  { %p705_p2 = pnand %p703_p1, %p700_p0 }
   0xc   :  { %708 = shalt.err (!%p705_p2)
}
   0xd   :  { %s709_s10 = scalar_lea.vmem %s42_s24, 1152  ;;  %p714_p4 = scmp.lt.s32.totalorder %s42_s24, %s42_s24 }
   0xe   :  { %p710_p3 = scmp.ne.s32.totalorder %s42_s24, %s709_s10  ;;  %p715_p5 = scmp.lt.s32.totalorder %s709_s10, %s709_s10 }
  0x10   :  { %p716_p6 = por %p715_p5, %p714_p4 }
  0x12   :  { %p717_p7 = pnand %p716_p6, %p710_p3 }
  0x14   :  { %720 = shalt.err (!%p717_p7)
}
  0x15   :  { %s818_s14 = smov 64   ;;  %s819_s15 = smov 4  }
  0x16   :  { %47 = dma.hbm_to_vmem [thread:$0]  %s1024_s2, 1152, %s42_s24, [#allocation7], %s818_s14, %s818_s14, %s819_s15  }
  0x17   :  { %s820_s18 = smov [#allocation3]   ;;  %s821_s20 = smov [#allocation8]  }
  0x18   :  { %s30_s19 = sshll.u32 %s820_s18, 4  ;;  %s55_s21 = sshll.u32 %s821_s20, 4  ;;  %s31_s19 = int_to_ptr.vmem [resolvable:$true] %s30_s19  ;;  %s56_s21 = int_to_ptr.vmem [resolvable:$true] %s55_s21 }
  0x19   :  { %s721_s25 = scalar_lea.hbm %s1022_s0, 64 }
  0x1a   :  { %p722_p8 = scmp.ne.s32.totalorder %s1022_s0, %s721_s25  ;;  %p725_p9 = scmp.lt.u32.totalorder %s721_s25, %s1022_s0 }
  0x1c   :  { %p727_p10 = pnand %p725_p9, %p722_p8 }
  0x1e   :  { %730 = shalt.err (!%p727_p10)
}
  0x1f   :  { %s731_s2 = scalar_lea.vmem %s31_s19, 64  ;;  %p736_p12 = scmp.lt.s32.totalorder %s31_s19, %s31_s19 }
  0x20   :  { %p732_p11 = scmp.ne.s32.totalorder %s31_s19, %s731_s2  ;;  %p737_p13 = scmp.lt.s32.totalorder %s731_s2, %s731_s2 }
  0x22   :  { %p738_p0 = por %p737_p13, %p736_p12 }
  0x24   :  { %p739_p1 = pnand %p738_p0, %p732_p11 }
  0x26   :  { %742 = shalt.err (!%p739_p1)
}
  0x27   :  { %33 = dma.hbm_to_vmem [thread:$0]  %s1022_s0, 64, %s31_s19, [#allocation4]  }
  0x28   :  { %s743_s16 = scalar_lea.hbm %s1026_s4, 1024 }
  0x29   :  { %p744_p2 = scmp.ne.s32.totalorder %s1026_s4, %s743_s16  ;;  %p747_p3 = scmp.lt.u32.totalorder %s743_s16, %s1026_s4 }
  0x2b   :  { %p749_p4 = pnand %p747_p3, %p744_p2 }
  0x2d   :  { %752 = shalt.err (!%p749_p4)
}
  0x2e   :  { %s753_s23 = scalar_lea.vmem %s56_s21, 1024  ;;  %p758_p6 = scmp.lt.s32.totalorder %s56_s21, %s56_s21 }
  0x2f   :  { %p754_p5 = scmp.ne.s32.totalorder %s56_s21, %s753_s23  ;;  %p759_p7 = scmp.lt.s32.totalorder %s753_s23, %s753_s23 }
  0x31   :  { %p760_p8 = por %p759_p7, %p758_p6 }
  0x33   :  { %p761_p9 = pnand %p760_p8, %p754_p5 }
  0x35   :  { %764 = shalt.err (!%p761_p9)
}
  0x36   :  { %61 = dma.hbm_to_vmem [thread:$0]  %s1026_s4, 1024, %s56_s21, [#allocation7], %s818_s14, %s818_s14, %s819_s15  }
  0x37   :  { %s822_s25 = smov [#allocation9]   ;;  %s765_s29 = scalar_lea.hbm %s1029_s7, 1024 }
  0x38   :  { %s71_s26 = sshll.u32 %s822_s25, 4  ;;  %p766_p10 = scmp.ne.s32.totalorder %s1029_s7, %s765_s29  ;;  %s72_s26 = int_to_ptr.vmem [resolvable:$true] %s71_s26 }
  0x39   :  { %p769_p11 = scmp.lt.u32.totalorder %s765_s29, %s1029_s7 }
  0x3b   :  { %p771_p12 = pnand %p769_p11, %p766_p10 }
  0x3d   :  { %774 = shalt.err (!%p771_p12)
}
  0x3e   :  { %s775_s10 = scalar_lea.vmem %s72_s26, 1024  ;;  %p780_p0 = scmp.lt.s32.totalorder %s72_s26, %s72_s26 }
  0x3f   :  { %p776_p13 = scmp.ne.s32.totalorder %s72_s26, %s775_s10  ;;  %p781_p1 = scmp.lt.s32.totalorder %s775_s10, %s775_s10 }
  0x41   :  { %p782_p2 = por %p781_p1, %p780_p0 }
  0x43   :  { %p783_p3 = pnand %p782_p2, %p776_p13 }
  0x45   :  { %786 = shalt.err (!%p783_p3)
}
  0x46   :  { %77 = dma.hbm_to_vmem [thread:$0]  %s1029_s7, 1024, %s72_s26, [#allocation10], %s818_s14, %s818_s14, %s819_s15  }
  0x47   :  { %809 = dma.done.wait [#allocation4], 64  }
  0x48   :  { %810 = vsyncadd [#allocation4], 4294967232 }
  0x49   :  { %811 = dma.done.wait [#allocation7], 2176  }
  0x4a   :  { %812 = vsyncadd [#allocation7], 4294965120 }
  0x4b   :  { %813 = dma.done.wait [#allocation10], 1024  }
  0x4c   :  { %814 = vsyncadd [#allocation10], 4294966272  ;;  %v823_v1 = vmov 0   ;;  %v824_v2 = vmov 0.0   ;;  %vm825_vm0 = vmmov 0   ;;  %v672_v3 = vld [vmem:[#allocation6] sm:$0xff]  }
  0x4d   :  { %200 = vmatprep.subr.bf16.mxu0 %v823_v1  ;;  %615 = vmatprep.subr.bf16.mxu1 %v824_v2  ;;  %v673_v4 = vld [vmem:[#allocation6 + $0x8] sm:$0xff]   ;;  %v674_v5 = vld [vmem:[#allocation6 + $0x10] sm:$0xff]   ;;  %vm266_vm1 = vcmask 1041408   ;;  %vm189_vm2 = vcmask 105472   ;;  %v261_v7 = vld [vmem:[%s1027_s5] sm:$0x3] }
  0x4e   :  { %617 = vmatprep.mubr.msk.bf16.mxu1 %vm825_vm0, %v824_v2  ;;  %201 = vmatpush1.bf16.msra.mxu0 %v672_v3  ;;  %v562_v6 = vld.sshfl [vmem:[#allocation3] sm:$0x33 pattern:$0x76325410]  ;;  %v268_v10 = vsel %vm266_vm1, %v261_v7, 0  ;;  %vm262_vm3 = vcmask 31744  }
  0x4f   :  { %202 = vmatprep.subr.bf16.mxu0 %v823_v1  ;;  %v675_v8 = vld [vmem:[#allocation6 + $0x18] sm:$0xff]   ;;  %v106_v9 = vcombine.high %v562_v6, %v562_v6  ;;  %616 = vmatpush3.bf16.msra.mxu1 %v268_v10  ;;  %v681_v14 = vld [vmem:[#allocation8] sm:$0xff]   ;;  %v676_v15 = vld [vmem:[#allocation6 + $0x20] sm:$0xff]   ;;  %vm193_vm4 = vcmask 1045504   ;;  %vm194_vm5 = vcmask 1046528   ;;  %v826_v20 = vmov 65535  }
  0x50   :  { %v242_v11 = vld [vmem:[%s1023_s1] sm:$0x3]  ;;  %621 = vmatprep.subr.bf16.mxu1 %v824_v2  ;;  %v682_v16 = vld [vmem:[#allocation8 + $0x8] sm:$0xff]   ;;  %v677_v17 = vld [vmem:[#allocation6 + $0x28] sm:$0xff]   ;;  %v195_v21 = vsel %vm193_vm4, 4294967295, %v826_v20  ;;  %v109_v27 = vpack.c.bf16 %v562_v6, %v562_v6 }
  0x51   :  { %v243_v12 = vpack.c.bf16 %v242_v11, %v242_v11  ;;  %v110_v13 = vpack.c.bf16 %v106_v9, %v106_v9  ;;  %v683_v18 = vld [vmem:[#allocation8 + $0x10] sm:$0xff]   ;;  %v678_v19 = vld [vmem:[#allocation6 + $0x30] sm:$0xff]   ;;  %v684_v22 = vld [vmem:[#allocation8 + $0x18] sm:$0xff]   ;;  %v196_v25 = vsel %vm194_vm5, %v195_v21, 0 }
  0x52   :  { %203 = vmatpush1.bf16.msra.mxu0 %v673_v4  ;;  %v679_v23 = vld [vmem:[#allocation6 + $0x38] sm:$0xff]   ;;  %v680_v24 = vld [vmem:[#allocation6 + $0x40] sm:$0x7f]   ;;  %v685_v28 = vld [vmem:[#allocation8 + $0x20] sm:$0xff]  }
  0x53   :  { %204 = vmatprep.subr.bf16.mxu0 %v823_v1  ;;  %573 = vmatprep.mubr.msk.bf16.mxu0 %vm189_vm2, %v110_v13  ;;  %v198_v26 = vand.u32 %v680_v24, %v196_v25  ;;  %v686_v29 = vld [vmem:[#allocation8 + $0x28] sm:$0xff]   ;;  %v687_v30 = vld [vmem:[#allocation8 + $0x30] sm:$0xff]   ;;  %v688_v31 = vld [vmem:[#allocation8 + $0x38] sm:$0xff]  }
  0x54   :  { %618 = vmatmul.mubr.msk.bf16.vlgmr.msra.gmra.mrb[0].mxu1 %vm262_vm3, %v243_v12  ;;  %v689_v32 = vld [vmem:[#allocation9] sm:$0xff]   ;;  %v690_v33 = vld [vmem:[#allocation9 + $0x8] sm:$0xff]   ;;  %v691_v34 = vld [vmem:[#allocation9 + $0x10] sm:$0xff]  }
  0x55   :  { %622 = vmatpush3.bf16.msra.mxu1 %v681_v14  ;;  %637 = vmatprep.mubr.msk.bf16.mxu1 %vm825_vm0, %v824_v2  ;;  %v692_v35 = vld [vmem:[#allocation9 + $0x18] sm:$0xff]   ;;  %v693_v36 = vld [vmem:[#allocation9 + $0x20] sm:$0xff]   ;;  %v694_v37 = vld [vmem:[#allocation9 + $0x28] sm:$0xff]  }
  0x56   :  { %205 = vmatpush1.bf16.msra.mxu0 %v674_v5  ;;  %623 = vmatprep.subr.bf16.mxu1 %v824_v2  ;;  %v563_v42 = vld [vmem:[%s1025_s3] ss:$0 sm:$0xff]  ;;  %v696_v51 = vld [vmem:[#allocation9 + $0x38] sm:$0xff]  }
  0x57   :  { %206 = vmatprep.subr.bf16.mxu0 %v823_v1  ;;  %v695_v50 = vld [vmem:[#allocation9 + $0x30] sm:$0xff]  }
  0x58   :  { %v583_v53 = vld [vmem:[%s1028_s6] ss:$0 sm:$0xff]  ;;  %s827_s6 = smov [#allocation11]  }
  0x59   :  { %624 = vmatpush3.bf16.msra.mxu1 %v682_v16  ;;  %v584_v61 = vld [vmem:[%s1030_s8] ss:$0 sm:$0xff]  ;;  %s549_s0 = sshll.u32 %s827_s6, 4  ;;  %s550_s0 = int_to_ptr.vmem [resolvable:$true] %s549_s0 }
  0x5a   :  { %207 = vmatpush1.bf16.msra.mxu0 %v675_v8  ;;  %625 = vmatprep.subr.bf16.mxu1 %v824_v2  ;;  %s787_s19 = scalar_lea.vmem %s550_s0, 32  ;;  %p792_p5 = scmp.lt.s32.totalorder %s550_s0, %s550_s0 }
  0x5b   :  { %208 = vmatprep.subr.bf16.mxu0 %v823_v1  ;;  %p788_p4 = scmp.ne.s32.totalorder %s550_s0, %s787_s19  ;;  %p793_p6 = scmp.lt.s32.totalorder %s787_s19, %s787_s19 }
  0x5d   :  { %626 = vmatpush3.bf16.msra.mxu1 %v683_v18  ;;  %p794_p7 = por %p793_p6, %p792_p5 }
  0x5e   :  { %209 = vmatpush1.bf16.msra.mxu0 %v676_v15  ;;  %627 = vmatprep.subr.bf16.mxu1 %v824_v2 }
  0x5f   :  { %210 = vmatprep.subr.bf16.mxu0 %v823_v1  ;;  %p795_p8 = pnand %p794_p7, %p788_p4 }
  0x61   :  { %628 = vmatpush3.bf16.msra.mxu1 %v684_v22 }
  0x62   :  { %211 = vmatpush1.bf16.msra.mxu0 %v677_v17  ;;  %629 = vmatprep.subr.bf16.mxu1 %v824_v2 }
  0x63   :  { %212 = vmatprep.subr.bf16.mxu0 %v823_v1 }
  0x65   :  { %630 = vmatpush3.bf16.msra.mxu1 %v685_v28 }
  0x66   :  { %213 = vmatpush1.bf16.msra.mxu0 %v678_v19  ;;  %631 = vmatprep.subr.bf16.mxu1 %v824_v2 }
  0x67   :  { %214 = vmatprep.subr.bf16.mxu0 %v823_v1 }
  0x69   :  { %632 = vmatpush3.bf16.msra.mxu1 %v686_v29 }
  0x6a   :  { %215 = vmatpush1.bf16.msra.mxu0 %v679_v23  ;;  %633 = vmatprep.subr.bf16.mxu1 %v824_v2 }
  0x6b   :  { %216 = vmatprep.subr.bf16.mxu0 %v823_v1 }
  0x6d   :  { %634 = vmatpush3.bf16.msra.mxu1 %v687_v30 }
  0x6e   :  { %217 = vmatpush1.bf16.msra.mxu0 %v198_v26  ;;  %635 = vmatprep.subr.bf16.mxu1 %v824_v2 }
  0x6f   :  { %641 = vmatprep.subr.bf16.mxu0 %v824_v2 }
  0x71   :  { %233 = vmatmul.mubr.bf16.vlgmr.msra.gmra.mrb[0].mxu0 %v109_v27  ;;  %636 = vmatpush3.bf16.msra.mxu1 %v688_v31 }
  0x72   :  { %657 = vmatprep.mubr.msk.bf16.mxu0 %vm825_vm0, %v824_v2  ;;  %642 = vmatpush3.bf16.msra.mxu0 %v689_v32 }
  0x73   :  { %643 = vmatprep.subr.bf16.mxu0 %v824_v2 }
  0x76   :  { %644 = vmatpush3.bf16.msra.mxu0 %v690_v33 }
  0x77   :  { %645 = vmatprep.subr.bf16.mxu0 %v824_v2 }
  0x7a   :  { %646 = vmatpush3.bf16.msra.mxu0 %v691_v34 }
  0x7b   :  { %647 = vmatprep.subr.bf16.mxu0 %v824_v2 }
  0x7e   :  { %648 = vmatpush3.bf16.msra.mxu0 %v692_v35 }
  0x7f   :  { %649 = vmatprep.subr.bf16.mxu0 %v824_v2 }
  0x82   :  { %650 = vmatpush3.bf16.msra.mxu0 %v693_v36 }
  0x83   :  { %651 = vmatprep.subr.bf16.mxu0 %v824_v2 }
  0x86   :  { %652 = vmatpush3.bf16.msra.mxu0 %v694_v37 }
  0x87   :  { %653 = vmatprep.subr.bf16.mxu0 %v824_v2 }
  0x8a   :  { %654 = vmatpush3.bf16.msra.mxu0 %v695_v50 }
  0x8b   :  { %655 = vmatprep.subr.bf16.mxu0 %v824_v2  ;;  %v593_v2 = vld [vmem:[%s1031_s9] ss:$0 sm:$0xff] }
  0x8e   :  { %656 = vmatpush3.bf16.msra.mxu0 %v696_v51 }
 0x127   :  { %v304_v38 = vpop.f32.mrb[0].mxu1 }
 0x128   :  { %v619_v39 = vpop.f32.mrb[1].mxu1 }
 0x129   :  { %v307_v40 = vpop.f32.mrb[2].mxu1 }
 0x12a   :  { %v620_v41 = vpop.f32.mrb[3].mxu1 }
 0x144   :  { %v234_v43 = vpop.f32.mrb[0].mxu0 }
 0x145   :  { %v235_v44 = vadd.f32 %v563_v42, %v234_v43  ;;  %v236_v45 = vpop.f32.mrb[1].mxu0 }
 0x146   :  { %v237_v46 = vpop.f32.mrb[2].mxu0 }
 0x147   :  { %697 = vtanh.f32 %v235_v44  ;;  %v238_v47 = vpop.f32.mrb[3].mxu0 }
 0x151   :  { %v698_v48 = vpop.eup %697 }
 0x152   :  { %241 = vst [vmem:[#allocation11] sm:$0x3] %v698_v48  ;;  %v244_v49 = vpack.c.bf16 %v698_v48, %v698_v48 }
 0x154   :  { %638 = vmatmul.mubr.bf16.vlgmr.msra.gmra.mrb[4].mxu1 %v244_v49 }
 0x227   :  { %v392_v52 = vpop.f32.mrb[4].mxu1 }
 0x228   :  { %v393_v54 = vadd.f32 %v392_v52, %v304_v38  ;;  %v639_v55 = vpop.f32.mrb[5].mxu1 }
 0x229   :  { %v395_v56 = vpop.f32.mrb[6].mxu1 }
 0x22a   :  { %v405_v57 = vadd.f32 %v583_v53, %v393_v54  ;;  %v640_v58 = vpop.f32.mrb[7].mxu1 }
 0x22c   :  { %v406_v59 = vmax.f32 %v405_v57, 0.0 }
 0x22e   :  { %v407_v60 = vpack.c.bf16 %v406_v59, %v406_v59 }
 0x230   :  { %658 = vmatmul.mubr.bf16.vlgmr.msra.gmra.mrb[4].mxu0 %v407_v60 }
 0x303   :  { %v513_v62 = vpop.f32.mrb[4].mxu0 }
 0x304   :  { %v514_v63 = vadd.f32 %v584_v61, %v513_v62  ;;  %v659_v0 = vpop.f32.mrb[5].mxu0 }
 0x305   :  { %v516_v1 = vpop.f32.mrb[6].mxu0 }
 0x306   :  { %v519_v3 = vmax.f32 %v514_v63, 0.0  ;;  %v660_v4 = vpop.f32.mrb[7].mxu0 }
 0x308   :  { %v527_v5 = vmul.f32 %v593_v2, %v519_v3 }
 0x30a   :  { %v528_v6 = vsel %vm266_vm1, %v527_v5, 0.0 }
 0x30b   :  { %529 = vadd.xlane.f32.xlu0 %v528_v6 }
 0x30c   :  { %798 = shalt.err (!%p795_p8)
}
 0x30d   :  { %s799_s9 = scalar_lea.hbm %s1034_s12, 32 }
 0x30e   :  { %p800_p9 = scmp.ne.s32.totalorder %s1034_s12, %s799_s9  ;;  %p803_p10 = scmp.lt.u32.totalorder %s799_s9, %s1034_s12 }
 0x310   :  { %p805_p11 = pnand %p803_p10, %p800_p9 }
 0x312   :  { %808 = shalt.err (!%p805_p11)
}
 0x313   :  { %552 = dma.vmem_to_hbm [thread:$0]  %s550_s0, 32, %s1034_s12, [#allocation5]   ;;  %v594_v7 = vld [vmem:[#allocation2] ss:$0 sm:$0xff]  ;;  %vm539_vm6 = vcmask 1024  }
 0x398   :  { %v530_v8 = vpop.xlane.xlu0 %529 }
 0x399   :  { %v538_v9 = vadd.f32 %v594_v7, %v530_v8 }
 0x39b   :  { %540 = vst.msk [vmem:[%s1033_s11] sm:$0x3] %vm539_vm6, %v538_v9 }
 0x39c   :  { %815 = dma.done.wait [#allocation5], 32  }
 0x39d   :  { %816 = vsyncadd [#allocation5], 4294967264 }
 0x39e   :  { %558 = vsyncpa [#allocation4], 1 }
 0x39f   :  { %559 = vsyncpa [#allocation7], 1 }
 0x3a0   :  { %560 = vsyncpa [#allocation10], 1 }
 0x3a1   :  { %561 = vsyncpa [#allocation5], 1 }

</bundles_post_ra>
